<compile_context>
chip_gen: v7x
topology: tpu7x:2x2x1
jax: 0.10.0
libtpu: 0.0.40
codegen_flags: <defaults>
</compile_context>

<pallas_src>
import functools
import math

import jax
import jax.numpy as jnp
from jax.experimental import pallas as pl
from jax.experimental.pallas import tpu as pltpu


def _make_pe_table(embedding_size: int, max_len: int) -> jnp.ndarray:
    """Deterministic sinusoidal table, identical to the PyTorch __init__."""
    position = jnp.arange(max_len, dtype=jnp.float32)[:, None]            # [L, 1]
    div_term = jnp.exp(
        jnp.arange(0, embedding_size, 2, dtype=jnp.float32)
        * -(math.log(10000.0) / embedding_size)
    )                                                                     # [E/2]
    pe = jnp.zeros((max_len, embedding_size), dtype=jnp.float32)
    pe = pe.at[:, 0::2].set(jnp.sin(position * div_term))
    pe = pe.at[:, 1::2].set(jnp.cos(position * div_term))
    return pe


def _pos_emb_kernel(idx_ref, pe_ref, o_ref, *, pack: int):
    # idx_ref: (TM, pack) int32 VMEM  -- pre-clamped pe row indices
    # pe_ref : (L, E) float32 VMEM    -- full table, resident across all steps
    # o_ref  : (TM, pack*E) float32   -- lane-dense output tile
    tm = o_ref.shape[0]
    L = pe_ref.shape[0]
    pe = pe_ref[...]
    idx = idx_ref[...]
    cols = jax.lax.broadcasted_iota(jnp.int32, (tm, L), 1)
    pieces = []
    for j in range(pack):                       # static unroll, pack is small
        onehot = (cols == idx[:, j:j + 1]).astype(jnp.float32)
        # Exactly one 1.0 per row -> the dot is an exact row copy of pe.
        pieces.append(jnp.dot(onehot, pe, preferred_element_type=jnp.float32))
    o_ref[...] = pieces[0] if pack == 1 else jnp.concatenate(pieces, axis=1)


def positional_embedding(visit_orders: jnp.ndarray,
                         pe: jnp.ndarray,
                         *,
                         tile_rows: int = 1024) -> jnp.ndarray:
    """visit_orders: [B, S] int; pe: [max_len, E] float32 -> [B, S, E] f32."""
    B, S = visit_orders.shape
    L, E = pe.shape
    R = B * S

    vo = visit_orders.astype(jnp.int32)
    pe32 = pe.astype(jnp.float32)

    # Forward-pass index math (subtract first visit, clamp) -- tiny [B, S]
    # integer op, free in XLA; keeps the kernel a pure vectorised gather.
    idx = jnp.clip(vo - vo[:, :1], 0, L - 1).reshape(R)

    # Lane-dense packing: fuse pack = 128 // E gathered rows into one 128-lane
    # output row so the stores are unmasked full-lane vst.
    if E < 128 and 128 % E == 0 and R % (128 // E) == 0:
        pack = 128 // E
    else:
        pack = 1
    Rp = R // pack                      # packed rows
    Ep = pack * E                       # packed (lane-dense) width
    idx2 = idx.reshape(Rp, pack)

    # ---- Row-tile size (in packed rows). ----
    tm = max(1, min(tile_rows, Rp))
    # VMEM budget ~40 MiB: 1x resident pe + 2x output tile + 2x idx tile +
    # one-hot intermediates; leaves headroom on v7x's 64 MiB/TC.
    budget = 40 * 1024 * 1024
    pe_bytes = L * E * 4
    per_row_bytes = 2 * Ep * 4 + 2 * pack * 4 + pack * L * 4
    if pe_bytes + 8 * per_row_bytes <= budget:
        tm = min(tm, (budget - pe_bytes) // per_row_bytes)
    # TODO(synk): if the pe table alone approaches the VMEM budget (huge
    # max_len), tile it over L / switch to a DMA gather instead of keeping it
    # fully resident.
    # Give the "parallel" axis >= 2 steps when there is enough work, so both
    # v7x TensorCores get rows (no effect on single-TC v5e/v6e).
    if Rp >= 16:
        tm = min(tm, max(8, -(-Rp // 2)))
    # Sublane alignment: a proper tile must be a multiple of 8 rows.
    if tm < Rp:
        tm = max(8, (tm // 8) * 8)
    else:
        tm = Rp
    n_tiles = -(-Rp // tm)

    # Zero-pad the (tiny) index array to a whole number of tiles so a partial
    # last tile never reads garbage indices.  The matching out-of-bounds tail
    # of the last output block is dropped by Pallas on writeback.
    padded_rows = n_tiles * tm
    if padded_rows != Rp:
        idx2 = jnp.concatenate(
            [idx2, jnp.zeros((padded_rows - Rp, pack), jnp.int32)], axis=0)

    kernel = functools.partial(_pos_emb_kernel, pack=pack)

    needed = pe_bytes + 2 * tm * Ep * 4 + 2 * tm * pack * 4 + tm * pack * L * 4
    vmem_limit = int(min(max(2 * needed, 32 * 1024 * 1024), 100 * 1024 * 1024))
    compiler_params = pltpu.CompilerParams(
        dimension_semantics=("parallel",),     # independent row tiles
        vmem_limit_bytes=vmem_limit,           # v5e default is only 16 MiB
    )

    def call(pe_spec):
        return pl.pallas_call(
            kernel,
            out_shape=jax.ShapeDtypeStruct((Rp, Ep), jnp.float32),
            grid=(n_tiles,),
            in_specs=[
                pl.BlockSpec((tm, pack), lambda i: (i, 0)),   # idx tile
                pe_spec,                                      # resident table
            ],
            out_specs=pl.BlockSpec((tm, Ep), lambda i: (i, 0)),
            compiler_params=compiler_params,
        )(idx2, pe32)

    # pe never changes across grid steps -> single-buffer it (halves its VMEM
    # footprint, which matters most on v7x).  Fall back to the default
    # double-buffered pipeline if this jax build rejects Buffered(1).
    try:
        out2d = call(pl.BlockSpec((L, E), lambda i: (0, 0),
                                  pipeline_mode=pl.Buffered(1)))
    except Exception:  # robustness fallback, retried without pipeline_mode
        out2d = call(pl.BlockSpec((L, E), lambda i: (0, 0)))

    # Row-major (Rp, pack*E) is exactly (R, E): both reshapes are free.
    return out2d.reshape(B, S, E)


if __name__ == "__main__":
    # Small shapes consistent with the module's forward.
    B, S = 2, 8          # batch, sequence of visit orders
    E, MAX_LEN = 32, 16  # embedding_size, max_len

    pe = _make_pe_table(E, MAX_LEN)

    key = jax.random.PRNGKey(0)
    # Monotone-ish visit orders with a random start offset so the first-visit
    # subtraction and the clamp are both exercised.
    start = jax.random.randint(key, (B, 1), minval=0, maxval=10)
    steps = jax.random.randint(jax.random.fold_in(key, 1), (B, S),
                               minval=0, maxval=4)
    visit_orders = (start + jnp.cumsum(steps, axis=1)).astype(jnp.int32)

    out = positional_embedding(visit_orders, pe)
    out = jax.block_until_ready(out)

    # Pure-JAX reference (same semantics as the PyTorch module).
    first = visit_orders[:, 0:1]
    idx_ref = jnp.clip(visit_orders - first, 0, MAX_LEN - 1)
    ref = pe[idx_ref]

    assert out.shape == (B, S, E) and out.dtype == jnp.float32
    # One-hot matmul is an exact row copy -> float equality.
    assert jnp.allclose(out, ref, atol=1e-6, rtol=0.0), "mismatch vs reference"
    print("KERNEL_OK")
</pallas_src>

<mosaic_0001>
module attributes {stable_mosaic.version = 11 : i64} {
  func.func @_pos_emb_kernel(%arg0: i32, %arg1: memref<4x4xi32, #tpu.memory_space<vmem>>, %arg2: memref<16x32xf32, #tpu.memory_space<vmem>>, %arg3: memref<4x128xf32, #tpu.memory_space<vmem>>) attributes {dimension_semantics = [#tpu.dimension_semantics<parallel>], iteration_bounds = array<i64: 1>, scalar_prefetch = 0 : i64, scratch_operands = 0 : i64, tpu.core_type = #tpu.core_type<tc>, window_params = [{transform_indices = @transform_0, window_bounds = array<i64: 4, 4>}, {pipeline_mode = #tpu.pipeline_mode<synchronous>, transform_indices = @transform_1, window_bounds = array<i64: 16, 32>}, {transform_indices = @transform_2, window_bounds = array<i64: 4, 128>}]} {
    %c0 = arith.constant 0 : index
    %c0_0 = arith.constant 0 : index
    %0 = vector.load %arg2[%c0, %c0_0] : memref<16x32xf32, #tpu.memory_space<vmem>>, vector<16x32xf32>
    %c0_1 = arith.constant 0 : index
    %c0_2 = arith.constant 0 : index
    %1 = vector.load %arg1[%c0_1, %c0_2] : memref<4x4xi32, #tpu.memory_space<vmem>>, vector<4x4xi32>
    %2 = tpu.iota {dimensions = array<i32: 1>} : vector<4x16xi32>
    %3 = vector.extract_strided_slice %1 {offsets = [0, 0], sizes = [4, 1], strides = [1, 1]} : vector<4x4xi32> to vector<4x1xi32>
    %4 = vector.broadcast %3 : vector<4x1xi32> to vector<4x16xi32>
    %5 = arith.cmpi eq, %2, %4 : vector<4x16xi32>
    %6 = arith.extui %5 : vector<4x16xi1> to vector<4x16xi32>
    %7 = arith.sitofp %6 : vector<4x16xi32> to vector<4x16xf32>
    %cst = arith.constant dense<0.000000e+00> : vector<4x32xf32>
    %8 = tpu.matmul %7, %0, %cst {dimension_numbers = #tpu.dot_dimension_numbers<[1], [0], [0], [1], [0, 0, 1, 1], [], []>} : vector<4x16xf32>, vector<16x32xf32>, vector<4x32xf32> -> vector<4x32xf32>
    %9 = vector.extract_strided_slice %1 {offsets = [0, 1], sizes = [4, 1], strides = [1, 1]} : vector<4x4xi32> to vector<4x1xi32>
    %10 = vector.broadcast %9 : vector<4x1xi32> to vector<4x16xi32>
    %11 = arith.cmpi eq, %2, %10 : vector<4x16xi32>
    %12 = arith.extui %11 : vector<4x16xi1> to vector<4x16xi32>
    %13 = arith.sitofp %12 : vector<4x16xi32> to vector<4x16xf32>
    %cst_3 = arith.constant dense<0.000000e+00> : vector<4x32xf32>
    %14 = tpu.matmul %13, %0, %cst_3 {dimension_numbers = #tpu.dot_dimension_numbers<[1], [0], [0], [1], [0, 0, 1, 1], [], []>} : vector<4x16xf32>, vector<16x32xf32>, vector<4x32xf32> -> vector<4x32xf32>
    %15 = vector.extract_strided_slice %1 {offsets = [0, 2], sizes = [4, 1], strides = [1, 1]} : vector<4x4xi32> to vector<4x1xi32>
    %16 = vector.broadcast %15 : vector<4x1xi32> to vector<4x16xi32>
    %17 = arith.cmpi eq, %2, %16 : vector<4x16xi32>
    %18 = arith.extui %17 : vector<4x16xi1> to vector<4x16xi32>
    %19 = arith.sitofp %18 : vector<4x16xi32> to vector<4x16xf32>
    %cst_4 = arith.constant dense<0.000000e+00> : vector<4x32xf32>
    %20 = tpu.matmul %19, %0, %cst_4 {dimension_numbers = #tpu.dot_dimension_numbers<[1], [0], [0], [1], [0, 0, 1, 1], [], []>} : vector<4x16xf32>, vector<16x32xf32>, vector<4x32xf32> -> vector<4x32xf32>
    %21 = vector.extract_strided_slice %1 {offsets = [0, 3], sizes = [4, 1], strides = [1, 1]} : vector<4x4xi32> to vector<4x1xi32>
    %22 = vector.broadcast %21 : vector<4x1xi32> to vector<4x16xi32>
    %23 = arith.cmpi eq, %2, %22 : vector<4x16xi32>
    %24 = arith.extui %23 : vector<4x16xi1> to vector<4x16xi32>
    %25 = arith.sitofp %24 : vector<4x16xi32> to vector<4x16xf32>
    %cst_5 = arith.constant dense<0.000000e+00> : vector<4x32xf32>
    %26 = tpu.matmul %25, %0, %cst_5 {dimension_numbers = #tpu.dot_dimension_numbers<[1], [0], [0], [1], [0, 0, 1, 1], [], []>} : vector<4x16xf32>, vector<16x32xf32>, vector<4x32xf32> -> vector<4x32xf32>
    %27 = tpu.concatenate %8, %14, %20, %26 in 1 : vector<4x32xf32>, vector<4x32xf32>, vector<4x32xf32>, vector<4x32xf32> -> vector<4x128xf32>
    %c0_6 = arith.constant 0 : index
    %c0_7 = arith.constant 0 : index
    %28 = vector.load %arg3[%c0_6, %c0_7] : memref<4x128xf32, #tpu.memory_space<vmem>>, vector<4x128xf32>
    tpu.vector_store %arg3[%c0_6, %c0_7], %27 {strides = array<i32>} : memref<4x128xf32, #tpu.memory_space<vmem>>, vector<4x128xf32>,
    return
  }
  func.func @transform_0(%arg0: i32) -> (i32, i32) {
    %c0_i32 = arith.constant 0 : i32
    %c0_i32_0 = arith.constant 0 : i32
    return %arg0, %c0_i32 : i32, i32
  }
  func.func @transform_1(%arg0: i32) -> (i32, i32) {
    %c0_i32 = arith.constant 0 : i32
    %c0_i32_0 = arith.constant 0 : i32
    %c0_i32_1 = arith.constant 0 : i32
    return %c0_i32, %c0_i32_0 : i32, i32
  }
  func.func @transform_2(%arg0: i32) -> (i32, i32) {
    %c0_i32 = arith.constant 0 : i32
    %c0_i32_0 = arith.constant 0 : i32
    return %arg0, %c0_i32 : i32, i32
  }
}

module attributes {stable_mosaic.version = 11 : i64} {
  func.func @_pos_emb_kernel(%arg0: i32, %arg1: memref<4x4xi32, #tpu.memory_space<vmem>>, %arg2: memref<16x32xf32, #tpu.memory_space<vmem>>, %arg3: memref<4x128xf32, #tpu.memory_space<vmem>>) attributes {dimension_semantics = [#tpu.dimension_semantics<parallel>], iteration_bounds = array<i64: 1>, scalar_prefetch = 0 : i64, scratch_operands = 0 : i64, tpu.core_type = #tpu.core_type<tc>, window_params = [{transform_indices = @transform_0, window_bounds = array<i64: 4, 4>}, {pipeline_mode = #tpu.pipeline_mode<synchronous>, transform_indices = @transform_1, window_bounds = array<i64: 16, 32>}, {transform_indices = @transform_2, window_bounds = array<i64: 4, 128>}]} {
    %c0 = arith.constant 0 : index
    %c0_0 = arith.constant 0 : index
    %0 = vector.load %arg2[%c0, %c0_0] : memref<16x32xf32, #tpu.memory_space<vmem>>, vector<16x32xf32>
    %c0_1 = arith.constant 0 : index
    %c0_2 = arith.constant 0 : index
    %1 = vector.load %arg1[%c0_1, %c0_2] : memref<4x4xi32, #tpu.memory_space<vmem>>, vector<4x4xi32>
    %2 = tpu.iota {dimensions = array<i32: 1>} : vector<4x16xi32>
    %3 = vector.extract_strided_slice %1 {offsets = [0, 0], sizes = [4, 1], strides = [1, 1]} : vector<4x4xi32> to vector<4x1xi32>
    %4 = vector.broadcast %3 : vector<4x1xi32> to vector<4x16xi32>
    %5 = arith.cmpi eq, %2, %4 : vector<4x16xi32>
    %6 = arith.extui %5 : vector<4x16xi1> to vector<4x16xi32>
    %7 = arith.sitofp %6 : vector<4x16xi32> to vector<4x16xf32>
    %cst = arith.constant dense<0.000000e+00> : vector<4x32xf32>
    %8 = tpu.matmul %7, %0, %cst {dimension_numbers = #tpu.dot_dimension_numbers<[1], [0], [0], [1], [0, 0, 1, 1], [], []>} : vector<4x16xf32>, vector<16x32xf32>, vector<4x32xf32> -> vector<4x32xf32>
    %9 = vector.extract_strided_slice %1 {offsets = [0, 1], sizes = [4, 1], strides = [1, 1]} : vector<4x4xi32> to vector<4x1xi32>
    %10 = vector.broadcast %9 : vector<4x1xi32> to vector<4x16xi32>
    %11 = arith.cmpi eq, %2, %10 : vector<4x16xi32>
    %12 = arith.extui %11 : vector<4x16xi1> to vector<4x16xi32>
    %13 = arith.sitofp %12 : vector<4x16xi32> to vector<4x16xf32>
    %cst_3 = arith.constant dense<0.000000e+00> : vector<4x32xf32>
    %14 = tpu.matmul %13, %0, %cst_3 {dimension_numbers = #tpu.dot_dimension_numbers<[1], [0], [0], [1], [0, 0, 1, 1], [], []>} : vector<4x16xf32>, vector<16x32xf32>, vector<4x32xf32> -> vector<4x32xf32>
    %15 = vector.extract_strided_slice %1 {offsets = [0, 2], sizes = [4, 1], strides = [1, 1]} : vector<4x4xi32> to vector<4x1xi32>
    %16 = vector.broadcast %15 : vector<4x1xi32> to vector<4x16xi32>
    %17 = arith.cmpi eq, %2, %16 : vector<4x16xi32>
    %18 = arith.extui %17 : vector<4x16xi1> to vector<4x16xi32>
    %19 = arith.sitofp %18 : vector<4x16xi32> to vector<4x16xf32>
    %cst_4 = arith.constant dense<0.000000e+00> : vector<4x32xf32>
    %20 = tpu.matmul %19, %0, %cst_4 {dimension_numbers = #tpu.dot_dimension_numbers<[1], [0], [0], [1], [0, 0, 1, 1], [], []>} : vector<4x16xf32>, vector<16x32xf32>, vector<4x32xf32> -> vector<4x32xf32>
    %21 = vector.extract_strided_slice %1 {offsets = [0, 3], sizes = [4, 1], strides = [1, 1]} : vector<4x4xi32> to vector<4x1xi32>
    %22 = vector.broadcast %21 : vector<4x1xi32> to vector<4x16xi32>
    %23 = arith.cmpi eq, %2, %22 : vector<4x16xi32>
    %24 = arith.extui %23 : vector<4x16xi1> to vector<4x16xi32>
    %25 = arith.sitofp %24 : vector<4x16xi32> to vector<4x16xf32>
    %cst_5 = arith.constant dense<0.000000e+00> : vector<4x32xf32>
    %26 = tpu.matmul %25, %0, %cst_5 {dimension_numbers = #tpu.dot_dimension_numbers<[1], [0], [0], [1], [0, 0, 1, 1], [], []>} : vector<4x16xf32>, vector<16x32xf32>, vector<4x32xf32> -> vector<4x32xf32>
    %27 = tpu.concatenate %8, %14, %20, %26 in 1 : vector<4x32xf32>, vector<4x32xf32>, vector<4x32xf32>, vector<4x32xf32> -> vector<4x128xf32>
    %c0_6 = arith.constant 0 : index
    %c0_7 = arith.constant 0 : index
    %28 = vector.load %arg3[%c0_6, %c0_7] : memref<4x128xf32, #tpu.memory_space<vmem>>, vector<4x128xf32>
    tpu.vector_store %arg3[%c0_6, %c0_7], %27 {strides = array<i32>} : memref<4x128xf32, #tpu.memory_space<vmem>>, vector<4x128xf32>,
    return
  }
  func.func @transform_0(%arg0: i32) -> (i32, i32) {
    %c0_i32 = arith.constant 0 : i32
    %c0_i32_0 = arith.constant 0 : i32
    return %arg0, %c0_i32 : i32, i32
  }
  func.func @transform_1(%arg0: i32) -> (i32, i32) {
    %c0_i32 = arith.constant 0 : i32
    %c0_i32_0 = arith.constant 0 : i32
    %c0_i32_1 = arith.constant 0 : i32
    return %c0_i32, %c0_i32_0 : i32, i32
  }
  func.func @transform_2(%arg0: i32) -> (i32, i32) {
    %c0_i32 = arith.constant 0 : i32
    %c0_i32_0 = arith.constant 0 : i32
    return %arg0, %c0_i32 : i32, i32
  }
}

</mosaic_0001>

<bundles_post_ra>
// kernel: tpu_custom_call.1
= control target key start
LH: loop header
LB: loop body
LE: loop exit
PB: predicated region body
PF: predicated region fallthrough
CT: control target
= control target key end

     0   :  { %7 = vsyncpa [#allocation3], 0  ;;  %s628_s0 = inlined_call_operand.hbm [shape: s32[4,4], index: 0, kind: input, shape index: {}]   ;;  %s629_s1 = inlined_call_operand.hbm [shape: f32[16,32], index: 1, kind: input, shape index: {}]   ;;  %s630_s2 = inlined_call_operand.hbm [shape: f32[4,128], index: 2, kind: output, shape index: {}]  }
   0x1   :  { %8 = vsyncpa [#allocation6], 0 }
   0x2   :  { %9 = vsyncpa [#allocation4], 0  ;;  %s547_s9 = smov [#allocation2]   ;;  %s548_s11 = smov [#allocation5]  }
   0x3   :  { %s16_s10 = sshll.u32 %s547_s9, 4  ;;  %s25_s12 = sshll.u32 %s548_s11, 4  ;;  %s17_s10 = int_to_ptr.vmem [resolvable:$true] %s16_s10  ;;  %s577_s12 = int_to_ptr.vmem [resolvable:$true] %s25_s12 }
   0x4   :  { %s475_s15 = scalar_lea.hbm %s628_s0, 64 }
   0x5   :  { %p476_p0 = scmp.ne.s32.totalorder %s628_s0, %s475_s15  ;;  %p479_p1 = scmp.lt.u32.totalorder %s475_s15, %s628_s0 }
   0x7   :  { %p481_p2 = pnand %p479_p1, %p476_p0 }
   0x9   :  { %484 = shalt.err (!%p481_p2)
}
   0xa   :  { %s485_s20 = scalar_lea.vmem %s17_s10, 64  ;;  %p490_p4 = scmp.lt.s32.totalorder %s17_s10, %s17_s10 }
   0xb   :  { %p486_p3 = scmp.ne.s32.totalorder %s17_s10, %s485_s20  ;;  %p491_p5 = scmp.lt.s32.totalorder %s485_s20, %s485_s20 }
   0xd   :  { %p492_p6 = por %p491_p5, %p490_p4 }
   0xf   :  { %p493_p7 = pnand %p492_p6, %p486_p3 }
  0x11   :  { %496 = shalt.err (!%p493_p7)
}
  0x12   :  { %19 = dma.hbm_to_vmem [thread:$0]  %s628_s0, 64, %s17_s10, [#allocation3]  }
  0x13   :  { %s497_s25 = scalar_lea.hbm %s629_s1, 256 }
  0x14   :  { %p498_p8 = scmp.ne.s32.totalorder %s629_s1, %s497_s25  ;;  %p501_p9 = scmp.lt.u32.totalorder %s497_s25, %s629_s1 }
  0x16   :  { %p503_p10 = pnand %p501_p9, %p498_p8 }
  0x18   :  { %506 = shalt.err (!%p503_p10)
}
  0x19   :  { %s507_s30 = scalar_lea.vmem %s577_s12, 256  ;;  %p512_p12 = scmp.lt.s32.totalorder %s577_s12, %s577_s12 }
  0x1a   :  { %p508_p11 = scmp.ne.s32.totalorder %s577_s12, %s507_s30  ;;  %p513_p13 = scmp.lt.s32.totalorder %s507_s30, %s507_s30 }
  0x1c   :  { %p514_p0 = por %p513_p13, %p512_p12 }
  0x1e   :  { %p515_p1 = pnand %p514_p0, %p508_p11 }
  0x20   :  { %518 = shalt.err (!%p515_p1)
}
  0x21   :  { %s549_s0 = smov 128   ;;  %s550_s3 = smov 8  }
  0x22   :  { %31 = dma.hbm_to_vmem [thread:$0]  %s629_s1, 256, %s577_s12, [#allocation6], %s549_s0, %s549_s0, %s550_s3  }
  0x23   :  { %541 = dma.done.wait [#allocation3], 64  }
  0x24   :  { %542 = vsyncadd [#allocation3], 4294967232 }
  0x25   :  { %543 = dma.done.wait [#allocation6], 256  }
  0x26   :  { %544 = vsyncadd [#allocation6], 4294967040  ;;  %v551_v0 = vmov 0   ;;  %v552_v1 = vmov 2   ;;  %v553_v2 = vmov 0.0|0.0   ;;  %v38_v4 = vld [vmem:[#allocation5] sm:$0xff]  ;;  %v41_v10 = vlaneseq }
  0x27   :  { %470 = vset.pattern.permute.xlu0 %v551_v0  ;;  %472 = vset.pattern.permute.xlu1 %v552_v1  ;;  %v40_v3 = vld [vmem:[#allocation2] sm:$0xf]  ;;  %v39_v5 = vld [vmem:[#allocation5 + $0x8] sm:$0xff]  ;;  %vm554_vm0 = vmmov 0   ;;  %v555_v7 = vmov 0.0   ;;  %v556_v8 = vmov 1  }
  0x28   :  { %443 = vmatprep.subr.bf16.mxu0 %v553_v2  ;;  %446 = vmatprep.subr.bf16.mxu1 %v553_v2  ;;  %v444_v6 = vpack.c.bf16 %v39_v5, %v38_v4  ;;  %v557_v9 = vmov 3   ;;  %v42_v11 = vand.u32 127, %v41_v10  ;;  %vm49_vm1 = vcmask 130048   ;;  %s558_s1 = smov 64   ;;  %s559_s6 = smov 32  }
  0x29   :  { %44 = vperm.xlu0 %470, %v40_v3   ;;  %203 = vperm.xlu1 %472, %v40_v3   ;;  %s560_s7 = smov 96   ;;  %vm372_vm6 = vcmask 261120   ;;  %vm374_vm7 = vcmask 523264   ;;  %s561_s8 = smov [#allocation7]   ;;  %vm376_vm8 = vcmask 785408  }
  0x2a   :  { %419 = vmatprep.mubr.msk.f32.mxu0 %vm554_vm0, %v555_v7  ;;  %426 = vmatprep.mubr.msk.f32.mxu1 %vm554_vm0, %v555_v7  ;;  %s385_s9 = sshll.u32 %s561_s8, 4  ;;  %s386_s9 = int_to_ptr.vmem [resolvable:$true] %s385_s9 }
  0x2b   :  { %445 = vmatpush3.bf16.msra.mxu0 %v444_v6  ;;  %448 = vmatpush3.bf16.msra.mxu1 %v444_v6  ;;  %s519_s10 = scalar_lea.vmem %s386_s9, 64  ;;  %p524_p3 = scmp.lt.s32.totalorder %s386_s9, %s386_s9 }
  0x2c   :  { %449 = vmatprep.subr.bf16.mxu0 %v553_v2  ;;  %452 = vmatprep.subr.bf16.mxu1 %v553_v2  ;;  %p520_p2 = scmp.ne.s32.totalorder %s386_s9, %s519_s10  ;;  %p525_p4 = scmp.lt.s32.totalorder %s519_s10, %s519_s10 }
  0x2d   :  { %471 = vset.pattern.permute.xlu0 %v556_v8  ;;  %473 = vset.pattern.permute.xlu1 %v557_v9 }
  0x2e   :  { %124 = vperm.xlu0 %471, %v40_v3   ;;  %282 = vperm.xlu1 %473, %v40_v3   ;;  %p526_p5 = por %p525_p4, %p524_p3 }
  0x30   :  { %p527_p6 = pnand %p526_p5, %p520_p2 }
  0x32   :  { %474 = vset.pattern.permute.xlu0 %v557_v9 }
  0xa8   :  { %v45_v12 = vpop.permute.xlu0 %44  ;;  %v204_v13 = vpop.permute.xlu1 %203 }
  0xa9   :  { %vm46_vm2 = vcmp.eq.s32.totalorder %v42_v11, %v45_v12  ;;  %vm205_vm3 = vcmp.eq.s32.totalorder %v42_v11, %v204_v13 }
  0xaa   :  { %v395_v14 = vsel %vm46_vm2, 1.0, %v555_v7  ;;  %v399_v15 = vsel %vm205_vm3, 1.0, %v555_v7 }
  0xab   :  { %420 = vmatmul.mubr.msk.f32.vlgmr.msra.gmra.mrb[0].mxu0 %vm49_vm1, %v395_v14 }
  0xac   :  { %451 = vmatpush3.bf16.msra.mxu0 %v444_v6  ;;  %433 = vmatprep.mubr.msk.f32.mxu0 %vm554_vm0, %v555_v7 }
  0xad   :  { %v125_v16 = vpop.permute.xlu0 %124  ;;  %v283_v17 = vpop.permute.xlu1 %282 }
  0xae   :  { %vm126_vm4 = vcmp.eq.s32.totalorder %v42_v11, %v125_v16  ;;  %vm284_vm5 = vcmp.eq.s32.totalorder %v42_v11, %v283_v17 }
  0xaf   :  { %v397_v18 = vsel %vm126_vm4, 1.0, %v555_v7  ;;  %434 = vmatmul.mubr.msk.f32.vlgmr.msra.gmra.mrb[2].mxu0 %vm49_vm1, %v399_v15  ;;  %v401_v19 = vsel %vm284_vm5, 1.0, %v555_v7 }
  0xb0   :  { %427 = vmatmul.mubr.msk.f32.vlgmr.msra.gmra.mrb[0].mxu1 %vm49_vm1, %v397_v18 }
  0xb1   :  { %454 = vmatpush3.bf16.msra.mxu1 %v444_v6  ;;  %440 = vmatprep.mubr.msk.f32.mxu1 %vm554_vm0, %v555_v7 }
  0xb4   :  { %441 = vmatmul.mubr.msk.f32.vlgmr.msra.gmra.mrb[2].mxu1 %vm49_vm1, %v401_v19 }
 0x17e   :  { %v119_v20 = vpop.f32.mrb[0].mxu0 }
 0x17f   :  { %v421_v21 = vpop.f32.mrb[1].mxu0 }
 0x182   :  { %v277_v22 = vpop.f32.mrb[2].mxu0 }
 0x183   :  { %v198_v23 = vpop.f32.mrb[0].mxu1  ;;  %365 = vrot.lane.b32.xlu0 %v277_v22, %s558_s1  ;;  %v435_v24 = vpop.f32.mrb[3].mxu0 }
 0x184   :  { %361 = vrot.lane.b32.xlu1 %v198_v23, %s559_s6  ;;  %v428_v25 = vpop.f32.mrb[1].mxu1 }
 0x187   :  { %v356_v26 = vpop.f32.mrb[2].mxu1 }
 0x188   :  { %369 = vrot.lane.b32.xlu1 %v356_v26, %s560_s7  ;;  %v442_v27 = vpop.f32.mrb[3].mxu1 }
 0x1f5   :  { %v366_v30 = vpop.permute.xlu0 %365 }
 0x1f6   :  { %v362_v28 = vpop.permute.xlu1 %361 }
 0x1f7   :  { %v373_v29 = vsel %vm372_vm6, %v119_v20, %v362_v28 }
 0x1f8   :  { %v375_v32 = vsel %vm374_vm7, %v373_v29, %v366_v30 }
 0x1fa   :  { %v370_v31 = vpop.permute.xlu1 %369 }
 0x1fb   :  { %v377_v33 = vsel %vm376_vm8, %v375_v32, %v370_v31 }
 0x1fc   :  { %378 = vst [vmem:[#allocation7] sm:$0xf] %v377_v33 }
 0x1fd   :  { %530 = shalt.err (!%p527_p6)
}
 0x1fe   :  { %s531_s13 = scalar_lea.hbm %s630_s2, 64 }
 0x1ff   :  { %p532_p7 = scmp.ne.s32.totalorder %s630_s2, %s531_s13  ;;  %p535_p8 = scmp.lt.u32.totalorder %s531_s13, %s630_s2 }
 0x201   :  { %p537_p9 = pnand %p535_p8, %p532_p7 }
 0x203   :  { %540 = shalt.err (!%p537_p9)
}
 0x204   :  { %388 = dma.vmem_to_hbm [thread:$0]  %s386_s9, 64, %s630_s2, [#allocation4]  }
 0x205   :  { %545 = dma.done.wait [#allocation4], 64  }
 0x206   :  { %546 = vsyncadd [#allocation4], 4294967232 }
 0x207   :  { %392 = vsyncpa [#allocation3], 1 }
 0x208   :  { %393 = vsyncpa [#allocation6], 1 }
 0x209   :  { %394 = vsyncpa [#allocation4], 1 }

// kernel: tpu_custom_call.1
= control target key start
LH: loop header
LB: loop body
LE: loop exit
PB: predicated region body
PF: predicated region fallthrough
CT: control target
= control target key end

     0   :  { %7 = vsyncpa [#allocation3], 0  ;;  %s628_s0 = inlined_call_operand.hbm [shape: s32[4,4], index: 0, kind: input, shape index: {}]   ;;  %s629_s1 = inlined_call_operand.hbm [shape: f32[16,32], index: 1, kind: input, shape index: {}]   ;;  %s630_s2 = inlined_call_operand.hbm [shape: f32[4,128], index: 2, kind: output, shape index: {}]  }
   0x1   :  { %8 = vsyncpa [#allocation6], 0 }
   0x2   :  { %9 = vsyncpa [#allocation4], 0  ;;  %s547_s9 = smov [#allocation2]   ;;  %s548_s11 = smov [#allocation5]  }
   0x3   :  { %s16_s10 = sshll.u32 %s547_s9, 4  ;;  %s25_s12 = sshll.u32 %s548_s11, 4  ;;  %s17_s10 = int_to_ptr.vmem [resolvable:$true] %s16_s10  ;;  %s577_s12 = int_to_ptr.vmem [resolvable:$true] %s25_s12 }
   0x4   :  { %s475_s15 = scalar_lea.hbm %s628_s0, 64 }
   0x5   :  { %p476_p0 = scmp.ne.s32.totalorder %s628_s0, %s475_s15  ;;  %p479_p1 = scmp.lt.u32.totalorder %s475_s15, %s628_s0 }
   0x7   :  { %p481_p2 = pnand %p479_p1, %p476_p0 }
   0x9   :  { %484 = shalt.err (!%p481_p2)
}
   0xa   :  { %s485_s20 = scalar_lea.vmem %s17_s10, 64  ;;  %p490_p4 = scmp.lt.s32.totalorder %s17_s10, %s17_s10 }
   0xb   :  { %p486_p3 = scmp.ne.s32.totalorder %s17_s10, %s485_s20  ;;  %p491_p5 = scmp.lt.s32.totalorder %s485_s20, %s485_s20 }
   0xd   :  { %p492_p6 = por %p491_p5, %p490_p4 }
   0xf   :  { %p493_p7 = pnand %p492_p6, %p486_p3 }
  0x11   :  { %496 = shalt.err (!%p493_p7)
}
  0x12   :  { %19 = dma.hbm_to_vmem [thread:$0]  %s628_s0, 64, %s17_s10, [#allocation3]  }
  0x13   :  { %s497_s25 = scalar_lea.hbm %s629_s1, 256 }
  0x14   :  { %p498_p8 = scmp.ne.s32.totalorder %s629_s1, %s497_s25  ;;  %p501_p9 = scmp.lt.u32.totalorder %s497_s25, %s629_s1 }
  0x16   :  { %p503_p10 = pnand %p501_p9, %p498_p8 }
  0x18   :  { %506 = shalt.err (!%p503_p10)
}
  0x19   :  { %s507_s30 = scalar_lea.vmem %s577_s12, 256  ;;  %p512_p12 = scmp.lt.s32.totalorder %s577_s12, %s577_s12 }
  0x1a   :  { %p508_p11 = scmp.ne.s32.totalorder %s577_s12, %s507_s30  ;;  %p513_p13 = scmp.lt.s32.totalorder %s507_s30, %s507_s30 }
  0x1c   :  { %p514_p0 = por %p513_p13, %p512_p12 }
  0x1e   :  { %p515_p1 = pnand %p514_p0, %p508_p11 }
  0x20   :  { %518 = shalt.err (!%p515_p1)
}
  0x21   :  { %s549_s0 = smov 128   ;;  %s550_s3 = smov 8  }
  0x22   :  { %31 = dma.hbm_to_vmem [thread:$0]  %s629_s1, 256, %s577_s12, [#allocation6], %s549_s0, %s549_s0, %s550_s3  }
  0x23   :  { %541 = dma.done.wait [#allocation3], 64  }
  0x24   :  { %542 = vsyncadd [#allocation3], 4294967232 }
  0x25   :  { %543 = dma.done.wait [#allocation6], 256  }
  0x26   :  { %544 = vsyncadd [#allocation6], 4294967040  ;;  %v551_v0 = vmov 0   ;;  %v552_v1 = vmov 2   ;;  %v553_v2 = vmov 0.0|0.0   ;;  %v38_v4 = vld [vmem:[#allocation5] sm:$0xff]  ;;  %v41_v10 = vlaneseq }
  0x27   :  { %470 = vset.pattern.permute.xlu0 %v551_v0  ;;  %472 = vset.pattern.permute.xlu1 %v552_v1  ;;  %v40_v3 = vld [vmem:[#allocation2] sm:$0xf]  ;;  %v39_v5 = vld [vmem:[#allocation5 + $0x8] sm:$0xff]  ;;  %vm554_vm0 = vmmov 0   ;;  %v555_v7 = vmov 0.0   ;;  %v556_v8 = vmov 1  }
  0x28   :  { %443 = vmatprep.subr.bf16.mxu0 %v553_v2  ;;  %446 = vmatprep.subr.bf16.mxu1 %v553_v2  ;;  %v444_v6 = vpack.c.bf16 %v39_v5, %v38_v4  ;;  %v557_v9 = vmov 3   ;;  %v42_v11 = vand.u32 127, %v41_v10  ;;  %vm49_vm1 = vcmask 130048   ;;  %s558_s1 = smov 64   ;;  %s559_s6 = smov 32  }
  0x29   :  { %44 = vperm.xlu0 %470, %v40_v3   ;;  %203 = vperm.xlu1 %472, %v40_v3   ;;  %s560_s7 = smov 96   ;;  %vm372_vm6 = vcmask 261120   ;;  %vm374_vm7 = vcmask 523264   ;;  %s561_s8 = smov [#allocation7]   ;;  %vm376_vm8 = vcmask 785408  }
  0x2a   :  { %419 = vmatprep.mubr.msk.f32.mxu0 %vm554_vm0, %v555_v7  ;;  %426 = vmatprep.mubr.msk.f32.mxu1 %vm554_vm0, %v555_v7  ;;  %s385_s9 = sshll.u32 %s561_s8, 4  ;;  %s386_s9 = int_to_ptr.vmem [resolvable:$true] %s385_s9 }
  0x2b   :  { %445 = vmatpush3.bf16.msra.mxu0 %v444_v6  ;;  %448 = vmatpush3.bf16.msra.mxu1 %v444_v6  ;;  %s519_s10 = scalar_lea.vmem %s386_s9, 64  ;;  %p524_p3 = scmp.lt.s32.totalorder %s386_s9, %s386_s9 }
  0x2c   :  { %449 = vmatprep.subr.bf16.mxu0 %v553_v2  ;;  %452 = vmatprep.subr.bf16.mxu1 %v553_v2  ;;  %p520_p2 = scmp.ne.s32.totalorder %s386_s9, %s519_s10  ;;  %p525_p4 = scmp.lt.s32.totalorder %s519_s10, %s519_s10 }
  0x2d   :  { %471 = vset.pattern.permute.xlu0 %v556_v8  ;;  %473 = vset.pattern.permute.xlu1 %v557_v9 }
  0x2e   :  { %124 = vperm.xlu0 %471, %v40_v3   ;;  %282 = vperm.xlu1 %473, %v40_v3   ;;  %p526_p5 = por %p525_p4, %p524_p3 }
  0x30   :  { %p527_p6 = pnand %p526_p5, %p520_p2 }
  0x32   :  { %474 = vset.pattern.permute.xlu0 %v557_v9 }
  0xa8   :  { %v45_v12 = vpop.permute.xlu0 %44  ;;  %v204_v13 = vpop.permute.xlu1 %203 }
  0xa9   :  { %vm46_vm2 = vcmp.eq.s32.totalorder %v42_v11, %v45_v12  ;;  %vm205_vm3 = vcmp.eq.s32.totalorder %v42_v11, %v204_v13 }
  0xaa   :  { %v395_v14 = vsel %vm46_vm2, 1.0, %v555_v7  ;;  %v399_v15 = vsel %vm205_vm3, 1.0, %v555_v7 }
  0xab   :  { %420 = vmatmul.mubr.msk.f32.vlgmr.msra.gmra.mrb[0].mxu0 %vm49_vm1, %v395_v14 }
  0xac   :  { %451 = vmatpush3.bf16.msra.mxu0 %v444_v6  ;;  %433 = vmatprep.mubr.msk.f32.mxu0 %vm554_vm0, %v555_v7 }
  0xad   :  { %v125_v16 = vpop.permute.xlu0 %124  ;;  %v283_v17 = vpop.permute.xlu1 %282 }
  0xae   :  { %vm126_vm4 = vcmp.eq.s32.totalorder %v42_v11, %v125_v16  ;;  %vm284_vm5 = vcmp.eq.s32.totalorder %v42_v11, %v283_v17 }
  0xaf   :  { %v397_v18 = vsel %vm126_vm4, 1.0, %v555_v7  ;;  %434 = vmatmul.mubr.msk.f32.vlgmr.msra.gmra.mrb[2].mxu0 %vm49_vm1, %v399_v15  ;;  %v401_v19 = vsel %vm284_vm5, 1.0, %v555_v7 }
  0xb0   :  { %427 = vmatmul.mubr.msk.f32.vlgmr.msra.gmra.mrb[0].mxu1 %vm49_vm1, %v397_v18 }
  0xb1   :  { %454 = vmatpush3.bf16.msra.mxu1 %v444_v6  ;;  %440 = vmatprep.mubr.msk.f32.mxu1 %vm554_vm0, %v555_v7 }
  0xb4   :  { %441 = vmatmul.mubr.msk.f32.vlgmr.msra.gmra.mrb[2].mxu1 %vm49_vm1, %v401_v19 }
 0x17e   :  { %v119_v20 = vpop.f32.mrb[0].mxu0 }
 0x17f   :  { %v421_v21 = vpop.f32.mrb[1].mxu0 }
 0x182   :  { %v277_v22 = vpop.f32.mrb[2].mxu0 }
 0x183   :  { %v198_v23 = vpop.f32.mrb[0].mxu1  ;;  %365 = vrot.lane.b32.xlu0 %v277_v22, %s558_s1  ;;  %v435_v24 = vpop.f32.mrb[3].mxu0 }
 0x184   :  { %361 = vrot.lane.b32.xlu1 %v198_v23, %s559_s6  ;;  %v428_v25 = vpop.f32.mrb[1].mxu1 }
 0x187   :  { %v356_v26 = vpop.f32.mrb[2].mxu1 }
 0x188   :  { %369 = vrot.lane.b32.xlu1 %v356_v26, %s560_s7  ;;  %v442_v27 = vpop.f32.mrb[3].mxu1 }
 0x1f5   :  { %v366_v30 = vpop.permute.xlu0 %365 }
 0x1f6   :  { %v362_v28 = vpop.permute.xlu1 %361 }
 0x1f7   :  { %v373_v29 = vsel %vm372_vm6, %v119_v20, %v362_v28 }
 0x1f8   :  { %v375_v32 = vsel %vm374_vm7, %v373_v29, %v366_v30 }
 0x1fa   :  { %v370_v31 = vpop.permute.xlu1 %369 }
 0x1fb   :  { %v377_v33 = vsel %vm376_vm8, %v375_v32, %v370_v31 }
 0x1fc   :  { %378 = vst [vmem:[#allocation7] sm:$0xf] %v377_v33 }
 0x1fd   :  { %530 = shalt.err (!%p527_p6)
}
 0x1fe   :  { %s531_s13 = scalar_lea.hbm %s630_s2, 64 }
 0x1ff   :  { %p532_p7 = scmp.ne.s32.totalorder %s630_s2, %s531_s13  ;;  %p535_p8 = scmp.lt.u32.totalorder %s531_s13, %s630_s2 }
 0x201   :  { %p537_p9 = pnand %p535_p8, %p532_p7 }
 0x203   :  { %540 = shalt.err (!%p537_p9)
}
 0x204   :  { %388 = dma.vmem_to_hbm [thread:$0]  %s386_s9, 64, %s630_s2, [#allocation4]  }
 0x205   :  { %545 = dma.done.wait [#allocation4], 64  }
 0x206   :  { %546 = vsyncadd [#allocation4], 4294967232 }
 0x207   :  { %392 = vsyncpa [#allocation3], 1 }
 0x208   :  { %393 = vsyncpa [#allocation6], 1 }
 0x209   :  { %394 = vsyncpa [#allocation4], 1 }

</bundles_post_ra>
